<compile_context>
chip_gen: v6e
topology: v6e:2x2x1
jax: 0.10.0
libtpu: 0.0.40
codegen_flags: <defaults>
</compile_context>

<pallas_src>
import functools

import jax
import jax.numpy as jnp
from jax.experimental import pallas as pl
from jax.experimental.pallas import tpu as pltpu

HIDDEN = 128  # per-branch hidden width (torch: nn.Linear(s_dim, 128))


def _round_up(x, m):
    return (x + m - 1) // m * m


def _a3c_kernel(x_ref, w_h_ref, b_h_ref, w_pi2_ref, b_pi2_ref, w_v2_ref, b_v2_ref,
                logits_ref, values_ref):
    # x_ref:     (bb, s_dim)            f32
    # w_h_ref:   (s_dim, 2H)            compute dtype   [W_pi1 | W_v1]
    # b_h_ref:   (1, 2H)                f32             [b_pi1 | b_v1]
    # w_pi2_ref: (H, a_dim)             compute dtype
    # b_pi2_ref: (1, a_dim)             f32
    # w_v2_ref:  (H, 1)                 compute dtype
    # b_v2_ref:  (1, 1)                 f32
    # logits_ref:(bb, a_dim)            f32
    # values_ref:(bb, 1)                f32
    cd = w_h_ref.dtype                    # compute dtype (f32 or bf16)
    hidden = w_pi2_ref.shape[0]

    x = x_ref[...].astype(cd)
    acc = jnp.dot(x, w_h_ref[...], preferred_element_type=jnp.float32) + b_h_ref[...]
    h = jnp.tanh(acc.astype(cd))          # both branches' hidden activations, (bb, 2H)

    # Slices at the 128-lane tile boundary -> no cross-lane shuffles.
    logits_ref[...] = (
        jnp.dot(h[:, :hidden], w_pi2_ref[...], preferred_element_type=jnp.float32)
        + b_pi2_ref[...]
    )
    values_ref[...] = (
        jnp.dot(h[:, hidden:], w_v2_ref[...], preferred_element_type=jnp.float32)
        + b_v2_ref[...]
    )


def fuse_params(params, compute_dtype=jnp.float32):
    """Build the fused first-layer weights ONCE (hoisted out of the step path).

    Weights are stored in `compute_dtype` (bf16 recommended on v6e/v7x);
    biases stay f32 (added to the f32 MXU accumulator).
    """
    w_h = jnp.concatenate([params["w_pi1"], params["w_v1"]], axis=1)  # (s_dim, 2H)
    b_h = jnp.concatenate([params["b_pi1"], params["b_v1"]], axis=1)  # (1, 2H)
    return {
        "w_h": w_h.astype(compute_dtype),
        "b_h": b_h.astype(jnp.float32),
        "w_pi2": params["w_pi2"].astype(compute_dtype),
        "b_pi2": params["b_pi2"].astype(jnp.float32),
        "w_v2": params["w_v2"].astype(compute_dtype),
        "b_v2": params["b_v2"].astype(jnp.float32),
    }


@functools.partial(jax.jit, static_argnames=("block_b",))
def a3c_net_forward(x, fused, *, block_b=2048):
    """Net.forward equivalent: returns (logits (B, a_dim), values (B, 1))."""
    B, s_dim = x.shape
    hidden2 = fused["w_h"].shape[1]        # 2H
    hidden = fused["w_pi2"].shape[0]       # H
    a_dim = fused["w_pi2"].shape[1]

    # Batch tile: guarantee >=2 grid steps when B >= 16 so the "parallel" axis
    # shards over both v7x TensorCores; cap at block_b (default 2048) so large
    # batches amortize the ~0.35us/step pipeline overhead.
    if B >= 16:
        bb = min(_round_up(block_b, 8), _round_up((B + 1) // 2, 8))
    else:
        bb = _round_up(max(B, 1), 8)
    B_pad = _round_up(B, bb)
    if B_pad != B:
        x = jnp.pad(x, ((0, B_pad - B), (0, 0)))
    grid = (B_pad // bb,)

    flops = 2 * B_pad * (s_dim * hidden2 + hidden * (a_dim + 1))
    bytes_accessed = (
        x.size * x.dtype.itemsize
        + sum(int(v.size) * v.dtype.itemsize for v in fused.values())
        + B_pad * (a_dim + 1) * 4
    )
    cost = pl.CostEstimate(
        flops=int(flops),
        transcendentals=int(B_pad * hidden2),
        bytes_accessed=int(bytes_accessed),
    )

    logits, values = pl.pallas_call(
        _a3c_kernel,
        out_shape=(
            jax.ShapeDtypeStruct((B_pad, a_dim), jnp.float32),
            jax.ShapeDtypeStruct((B_pad, 1), jnp.float32),
        ),
        grid=grid,
        in_specs=[
            pl.BlockSpec((bb, s_dim), lambda i: (i, 0)),          # x: tiled over batch
            pl.BlockSpec(fused["w_h"].shape, lambda i: (0, 0)),   # weights VMEM-resident
            pl.BlockSpec(fused["b_h"].shape, lambda i: (0, 0)),
            pl.BlockSpec(fused["w_pi2"].shape, lambda i: (0, 0)),
            pl.BlockSpec(fused["b_pi2"].shape, lambda i: (0, 0)),
            pl.BlockSpec(fused["w_v2"].shape, lambda i: (0, 0)),
            pl.BlockSpec(fused["b_v2"].shape, lambda i: (0, 0)),
        ],
        out_specs=(
            pl.BlockSpec((bb, a_dim), lambda i: (i, 0)),          # packed logits
            pl.BlockSpec((bb, 1), lambda i: (i, 0)),              # packed values
        ),
        compiler_params=pltpu.CompilerParams(
            dimension_semantics=("parallel",),
        ),
        cost_estimate=cost,
    )(x, fused["w_h"], fused["b_h"], fused["w_pi2"], fused["b_pi2"],
      fused["w_v2"], fused["b_v2"])

    if B_pad != B:
        logits = logits[:B]
        values = values[:B]
    return logits, values


def init_params(key, s_dim, a_dim, hidden=HIDDEN):
    """Matches set_init: weights ~ N(0, 0.1), biases = 0. Stored as (in, out)."""
    k1, k2, k3, k4 = jax.random.split(key, 4)
    std = 0.1
    return {
        "w_pi1": jax.random.normal(k1, (s_dim, hidden), jnp.float32) * std,
        "b_pi1": jnp.zeros((1, hidden), jnp.float32),
        "w_pi2": jax.random.normal(k2, (hidden, a_dim), jnp.float32) * std,
        "b_pi2": jnp.zeros((1, a_dim), jnp.float32),
        "w_v1":  jax.random.normal(k3, (s_dim, hidden), jnp.float32) * std,
        "b_v1":  jnp.zeros((1, hidden), jnp.float32),
        "w_v2":  jax.random.normal(k4, (hidden, 1), jnp.float32) * std,
        "b_v2":  jnp.zeros((1, 1), jnp.float32),
    }


if __name__ == "__main__":
    key = jax.random.PRNGKey(0)
    k_params, k_x = jax.random.split(key)

    # Small shapes consistent with an A3C policy/value net (e.g. CartPole: s_dim=4, a_dim=2)
    B, S_DIM, A_DIM = 8, 4, 2
    params = init_params(k_params, S_DIM, A_DIM)
    x = jax.random.normal(k_x, (B, S_DIM), jnp.float32)

    # Fused weights built ONCE, outside the per-step path.
    fused_f32 = fuse_params(params, jnp.float32)       # exact path (unit tests / v5e)
    fused_bf16 = fuse_params(params, jnp.bfloat16)     # fast MXU path (v6e / v7x)

    logits, values = jax.block_until_ready(a3c_net_forward(x, fused_f32))

    # Plain-JAX reference (same math as the torch forward).
    pi1 = jnp.tanh(x @ params["w_pi1"] + params["b_pi1"])
    ref_logits = pi1 @ params["w_pi2"] + params["b_pi2"]
    v1 = jnp.tanh(x @ params["w_v1"] + params["b_v1"])
    ref_values = v1 @ params["w_v2"] + params["b_v2"]

    assert logits.shape == (B, A_DIM) and values.shape == (B, 1)
    assert jnp.allclose(logits, ref_logits, atol=1e-5, rtol=1e-5)
    assert jnp.allclose(values, ref_values, atol=1e-5, rtol=1e-5)

    # bf16 compute path: same kernel, looser tolerance vs. f32 reference.
    logits_bf16, values_bf16 = jax.block_until_ready(a3c_net_forward(x, fused_bf16))
    assert jnp.allclose(logits_bf16, ref_logits, atol=3e-2, rtol=3e-2)
    assert jnp.allclose(values_bf16, ref_values, atol=3e-2, rtol=3e-2)

    # TODO(synk): choose_action (Categorical sampling) and loss_func are host/XLA-level
    # training utilities, not part of the forward pass, and are not implemented here.
    print("KERNEL_OK")
</pallas_src>

<mosaic_0001>
module attributes {stable_mosaic.version = 11 : i64} {
  func.func @_a3c_kernel(%arg0: i32, %arg1: memref<8x4xf32, #tpu.memory_space<vmem>>, %arg2: memref<4x256xf32, #tpu.memory_space<vmem>>, %arg3: memref<1x256xf32, #tpu.memory_space<vmem>>, %arg4: memref<128x2xf32, #tpu.memory_space<vmem>>, %arg5: memref<1x2xf32, #tpu.memory_space<vmem>>, %arg6: memref<128x1xf32, #tpu.memory_space<vmem>>, %arg7: memref<1x1xf32, #tpu.memory_space<vmem>>, %arg8: memref<8x2xf32, #tpu.memory_space<vmem>>, %arg9: memref<8x1xf32, #tpu.memory_space<vmem>>) attributes {dimension_semantics = [#tpu.dimension_semantics<parallel>], iteration_bounds = array<i64: 1>, scalar_prefetch = 0 : i64, scratch_operands = 0 : i64, tpu.core_type = #tpu.core_type<tc>, window_params = [{transform_indices = @transform_0, window_bounds = array<i64: 8, 4>}, {pipeline_mode = #tpu.pipeline_mode<synchronous>, transform_indices = @transform_1, window_bounds = array<i64: 4, 256>}, {pipeline_mode = #tpu.pipeline_mode<synchronous>, transform_indices = @transform_2, window_bounds = array<i64: 1, 256>}, {pipeline_mode = #tpu.pipeline_mode<synchronous>, transform_indices = @transform_3, window_bounds = array<i64: 128, 2>}, {pipeline_mode = #tpu.pipeline_mode<synchronous>, transform_indices = @transform_4, window_bounds = array<i64: 1, 2>}, {pipeline_mode = #tpu.pipeline_mode<synchronous>, transform_indices = @transform_5, window_bounds = array<i64: 128, 1>}, {pipeline_mode = #tpu.pipeline_mode<synchronous>, transform_indices = @transform_6, window_bounds = array<i64: 1, 1>}, {transform_indices = @transform_7, window_bounds = array<i64: 8, 2>}, {transform_indices = @transform_8, window_bounds = array<i64: 8, 1>}]} {
    %c0 = arith.constant 0 : index
    %c0_0 = arith.constant 0 : index
    %0 = vector.load %arg1[%c0, %c0_0] : memref<8x4xf32, #tpu.memory_space<vmem>>, vector<8x4xf32>
    %c0_1 = arith.constant 0 : index
    %c0_2 = arith.constant 0 : index
    %1 = vector.load %arg2[%c0_1, %c0_2] : memref<4x256xf32, #tpu.memory_space<vmem>>, vector<4x256xf32>
    %cst = arith.constant dense<0.000000e+00> : vector<8x256xf32>
    %2 = tpu.matmul %0, %1, %cst {dimension_numbers = #tpu.dot_dimension_numbers<[1], [0], [0], [1], [0, 0, 1, 1], [], []>} : vector<8x4xf32>, vector<4x256xf32>, vector<8x256xf32> -> vector<8x256xf32>
    %c0_3 = arith.constant 0 : index
    %c0_4 = arith.constant 0 : index
    %3 = vector.load %arg3[%c0_3, %c0_4] : memref<1x256xf32, #tpu.memory_space<vmem>>, vector<1x256xf32>
    %4 = vector.broadcast %3 : vector<1x256xf32> to vector<8x256xf32>
    %5 = arith.addf %2, %4 : vector<8x256xf32>
    %6 = math.tanh %5 : vector<8x256xf32>
    %7 = vector.extract_strided_slice %6 {offsets = [0, 0], sizes = [8, 128], strides = [1, 1]} : vector<8x256xf32> to vector<8x128xf32>
    %c0_5 = arith.constant 0 : index
    %c0_6 = arith.constant 0 : index
    %8 = vector.load %arg4[%c0_5, %c0_6] : memref<128x2xf32, #tpu.memory_space<vmem>>, vector<128x2xf32>
    %cst_7 = arith.constant dense<0.000000e+00> : vector<8x2xf32>
    %9 = tpu.matmul %7, %8, %cst_7 {dimension_numbers = #tpu.dot_dimension_numbers<[1], [0], [0], [1], [0, 0, 1, 1], [], []>} : vector<8x128xf32>, vector<128x2xf32>, vector<8x2xf32> -> vector<8x2xf32>
    %c0_8 = arith.constant 0 : index
    %c0_9 = arith.constant 0 : index
    %10 = vector.load %arg5[%c0_8, %c0_9] : memref<1x2xf32, #tpu.memory_space<vmem>>, vector<1x2xf32>
    %11 = vector.broadcast %10 : vector<1x2xf32> to vector<8x2xf32>
    %12 = arith.addf %9, %11 : vector<8x2xf32>
    %c0_10 = arith.constant 0 : index
    %c0_11 = arith.constant 0 : index
    %13 = vector.load %arg8[%c0_10, %c0_11] : memref<8x2xf32, #tpu.memory_space<vmem>>, vector<8x2xf32>
    tpu.vector_store %arg8[%c0_10, %c0_11], %12 {strides = array<i32>} : memref<8x2xf32, #tpu.memory_space<vmem>>, vector<8x2xf32>,
    %14 = vector.extract_strided_slice %6 {offsets = [0, 128], sizes = [8, 128], strides = [1, 1]} : vector<8x256xf32> to vector<8x128xf32>
    %c0_12 = arith.constant 0 : index
    %c0_13 = arith.constant 0 : index
    %15 = vector.load %arg6[%c0_12, %c0_13] : memref<128x1xf32, #tpu.memory_space<vmem>>, vector<128x1xf32>
    %cst_14 = arith.constant dense<0.000000e+00> : vector<8x1xf32>
    %16 = tpu.matmul %14, %15, %cst_14 {dimension_numbers = #tpu.dot_dimension_numbers<[1], [0], [0], [1], [0, 0, 1, 1], [], []>} : vector<8x128xf32>, vector<128x1xf32>, vector<8x1xf32> -> vector<8x1xf32>
    %c0_15 = arith.constant 0 : index
    %c0_16 = arith.constant 0 : index
    %17 = vector.load %arg7[%c0_15, %c0_16] : memref<1x1xf32, #tpu.memory_space<vmem>>, vector<1x1xf32>
    %18 = vector.broadcast %17 : vector<1x1xf32> to vector<8x1xf32>
    %19 = arith.addf %16, %18 : vector<8x1xf32>
    %c0_17 = arith.constant 0 : index
    %c0_18 = arith.constant 0 : index
    %20 = vector.load %arg9[%c0_17, %c0_18] : memref<8x1xf32, #tpu.memory_space<vmem>>, vector<8x1xf32>
    tpu.vector_store %arg9[%c0_17, %c0_18], %19 {strides = array<i32>} : memref<8x1xf32, #tpu.memory_space<vmem>>, vector<8x1xf32>,
    return
  }
  func.func @transform_0(%arg0: i32) -> (i32, i32) {
    %c0_i32 = arith.constant 0 : i32
    %c0_i32_0 = arith.constant 0 : i32
    return %arg0, %c0_i32 : i32, i32
  }
  func.func @transform_1(%arg0: i32) -> (i32, i32) {
    %c0_i32 = arith.constant 0 : i32
    %c0_i32_0 = arith.constant 0 : i32
    %c0_i32_1 = arith.constant 0 : i32
    return %c0_i32, %c0_i32_0 : i32, i32
  }
  func.func @transform_2(%arg0: i32) -> (i32, i32) {
    %c0_i32 = arith.constant 0 : i32
    %c0_i32_0 = arith.constant 0 : i32
    %c0_i32_1 = arith.constant 0 : i32
    return %c0_i32, %c0_i32_0 : i32, i32
  }
  func.func @transform_3(%arg0: i32) -> (i32, i32) {
    %c0_i32 = arith.constant 0 : i32
    %c0_i32_0 = arith.constant 0 : i32
    %c0_i32_1 = arith.constant 0 : i32
    return %c0_i32, %c0_i32_0 : i32, i32
  }
  func.func @transform_4(%arg0: i32) -> (i32, i32) {
    %c0_i32 = arith.constant 0 : i32
    %c0_i32_0 = arith.constant 0 : i32
    %c0_i32_1 = arith.constant 0 : i32
    return %c0_i32, %c0_i32_0 : i32, i32
  }
  func.func @transform_5(%arg0: i32) -> (i32, i32) {
    %c0_i32 = arith.constant 0 : i32
    %c0_i32_0 = arith.constant 0 : i32
    %c0_i32_1 = arith.constant 0 : i32
    return %c0_i32, %c0_i32_0 : i32, i32
  }
  func.func @transform_6(%arg0: i32) -> (i32, i32) {
    %c0_i32 = arith.constant 0 : i32
    %c0_i32_0 = arith.constant 0 : i32
    %c0_i32_1 = arith.constant 0 : i32
    return %c0_i32, %c0_i32_0 : i32, i32
  }
  func.func @transform_7(%arg0: i32) -> (i32, i32) {
    %c0_i32 = arith.constant 0 : i32
    %c0_i32_0 = arith.constant 0 : i32
    return %arg0, %c0_i32 : i32, i32
  }
  func.func @transform_8(%arg0: i32) -> (i32, i32) {
    %c0_i32 = arith.constant 0 : i32
    %c0_i32_0 = arith.constant 0 : i32
    return %arg0, %c0_i32 : i32, i32
  }
}

</mosaic_0001>

<bundles_post_ra>
// kernel: a3c_net_forward.1
= control target key start
LH: loop header
LB: loop body
LE: loop exit
PB: predicated region body
PF: predicated region fallthrough
CT: control target
= control target key end

     0   :  { %vm50_vm0 = vcmask 1043456   ;;  %v442_v1 = vmov 0.0   ;;  %vm46_vm1 = vcmask 31744   ;;  %vm443_vm2 = vmmov 0   ;;  %s643_s1 = inlined_call_operand.vmem [shape: f32[4,256], index: 1, kind: input, shape index: {}]   ;;  %s644_s0 = inlined_call_operand.vmem [shape: f32[8,4], index: 0, kind: input, shape index: {}]   ;;  %s645_s3 = inlined_call_operand.vmem [shape: f32[128,2], index: 3, kind: input, shape index: {}]   ;;  %s646_s5 = inlined_call_operand.vmem [shape: f32[128,1], index: 5, kind: input, shape index: {}]   ;;  %s647_s2 = inlined_call_operand.vmem [shape: f32[1,256], index: 2, kind: input, shape index: {}]   ;;  %s648_s6 = inlined_call_operand.<no memory space> [shape: f32[1,1], index: 6, kind: input, shape index: {}]   ;;  %s649_s4 = inlined_call_operand.vmem [shape: f32[1,2], index: 4, kind: input, shape index: {}]   ;;  %s650_s7 = inlined_call_operand.vmem [shape: f32[8,2], index: 7, kind: output, shape index: {0}]   ;;  %s651_s8 = inlined_call_operand.vmem [shape: f32[8,1], index: 8, kind: output, shape index: {1}]  }
   0x1   :  { %v31_v0 = vld [vmem:[%s643_s1] sm:$0xff]  ;;  %119 = vmatprep.mubr.f32.mxu0 %v442_v1  ;;  %365 = vmatprep.subr.mxu1 %v442_v1  ;;  %v143_v2 = vld [vmem:[%s645_s3 + $0x78] sm:$0xff]  ;;  %v142_v4 = vld [vmem:[%s645_s3 + $0x70] sm:$0xff]  ;;  %v34_v36 = vlaneseq  ;;  %v14_v49 = vstv %s648_s6  ;;  %vm221_vm3 = vcmask 15360   ;;  %vm316_vm4 = vcmask 7168  }
   0x2   :  { %v45_v3 = vcombine.high %v31_v0, %v31_v0  ;;  %366 = vmatpush3.msra.mxu1 %v143_v2  ;;  %v30_v5 = vld [vmem:[%s644_s0] sm:$0xff]  ;;  %v238_v6 = vld [vmem:[%s646_s5 + $0x78] sm:$0xff]  ;;  %v141_v7 = vld [vmem:[%s645_s3 + $0x68] sm:$0xff]  ;;  %397 = vmatprep.mubr.msk.f32.mxu1 %vm443_vm2, %v442_v1  ;;  %15 = vst [vmem:[#allocation2] sm:$0x1] %v14_v49 }
   0x3   :  { %367 = vmatprep.subr.mxu1 %v442_v1  ;;  %v237_v8 = vld [vmem:[%s646_s5 + $0x70] sm:$0xff]  ;;  %v140_v9 = vld [vmem:[%s645_s3 + $0x60] sm:$0xff]  ;;  %v236_v10 = vld [vmem:[%s646_s5 + $0x68] sm:$0xff]  ;;  %v35_v37 = vshrl.u32 %v34_v36, 7 }
   0x4   :  { %326 = vmatprep.subr.msk.mxu0 %vm50_vm0, %v45_v3  ;;  %368 = vmatpush3.msra.mxu1 %v142_v4  ;;  %v139_v11 = vld [vmem:[%s645_s3 + $0x58] sm:$0xff]  ;;  %v235_v12 = vld [vmem:[%s646_s5 + $0x60] sm:$0xff]  ;;  %v138_v13 = vld [vmem:[%s645_s3 + $0x50] sm:$0xff] }
   0x5   :  { %327 = vmatpush1.msk.msra.mxu0 %vm50_vm0, %v31_v0  ;;  %369 = vmatprep.subr.mxu1 %v442_v1  ;;  %v234_v14 = vld [vmem:[%s646_s5 + $0x58] sm:$0xff]  ;;  %v137_v15 = vld [vmem:[%s645_s3 + $0x48] sm:$0xff]  ;;  %v233_v16 = vld [vmem:[%s646_s5 + $0x50] sm:$0xff]  ;;  %v36_v38 = vsub.s32 0, %v35_v37  ;;  %v40_v40 = vsub.s32 1, %v35_v37 }
   0x6   :  { %328 = vmatmul.mubr.msk.f32.vlgmr.msra.gmra.mxu0 %vm46_vm1, %v30_v5  ;;  %400 = vmatprep.subr.mxu0 %v442_v1  ;;  %v136_v17 = vld [vmem:[%s645_s3 + $0x40] sm:$0xff]  ;;  %v232_v18 = vld [vmem:[%s646_s5 + $0x48] sm:$0xff]  ;;  %v135_v19 = vld [vmem:[%s645_s3 + $0x38] sm:$0xff] }
   0x7   :  { %401 = vmatpush3.msra.mxu0 %v238_v6  ;;  %370 = vmatpush3.msra.mxu1 %v141_v7  ;;  %v231_v20 = vld [vmem:[%s646_s5 + $0x40] sm:$0xff]  ;;  %v134_v21 = vld [vmem:[%s645_s3 + $0x30] sm:$0xff]  ;;  %v230_v22 = vld [vmem:[%s646_s5 + $0x38] sm:$0xff] }
   0x8   :  { %402 = vmatprep.subr.mxu0 %v442_v1  ;;  %371 = vmatprep.subr.mxu1 %v442_v1  ;;  %v133_v23 = vld [vmem:[%s645_s3 + $0x28] sm:$0xff]  ;;  %v229_v24 = vld [vmem:[%s646_s5 + $0x30] sm:$0xff]  ;;  %v132_v25 = vld [vmem:[%s645_s3 + $0x20] sm:$0xff] }
   0x9   :  { %403 = vmatpush3.msra.mxu0 %v237_v8  ;;  %372 = vmatpush3.msra.mxu1 %v140_v9  ;;  %v228_v26 = vld [vmem:[%s646_s5 + $0x28] sm:$0xff]  ;;  %v131_v27 = vld [vmem:[%s645_s3 + $0x18] sm:$0xff]  ;;  %v227_v28 = vld [vmem:[%s646_s5 + $0x20] sm:$0xff] }
   0xa   :  { %404 = vmatprep.subr.mxu0 %v442_v1  ;;  %373 = vmatprep.subr.mxu1 %v442_v1  ;;  %v130_v29 = vld [vmem:[%s645_s3 + $0x10] sm:$0xff]  ;;  %v226_v30 = vld [vmem:[%s646_s5 + $0x18] sm:$0xff]  ;;  %v129_v31 = vld [vmem:[%s645_s3 + $0x8] sm:$0xff] }
   0xb   :  { %405 = vmatpush3.msra.mxu0 %v236_v10  ;;  %374 = vmatpush3.msra.mxu1 %v139_v11  ;;  %v225_v32 = vld [vmem:[%s646_s5 + $0x10] sm:$0xff]  ;;  %v128_v33 = vld [vmem:[%s645_s3] sm:$0xff]  ;;  %v224_v34 = vld [vmem:[%s646_s5 + $0x8] sm:$0xff] }
   0xc   :  { %406 = vmatprep.subr.mxu0 %v442_v1  ;;  %375 = vmatprep.subr.mxu1 %v442_v1  ;;  %v223_v35 = vld [vmem:[%s646_s5] sm:$0xff] }
   0xd   :  { %407 = vmatpush3.msra.mxu0 %v235_v12  ;;  %376 = vmatpush3.msra.mxu1 %v138_v13  ;;  %v32_v39 = vld [vmem:[%s647_s2] sm:$0x3] }
   0xe   :  { %408 = vmatprep.subr.mxu0 %v442_v1  ;;  %377 = vmatprep.subr.mxu1 %v442_v1  ;;  %v37_v41 = vrot.slane %v32_v39, %v36_v38  ;;  %v41_v42 = vrot.slane %v32_v39, %v40_v40  ;;  %v329_v50 = vld [vmem:[%s649_s4] ss:$0 sm:$0xff] }
   0xf   :  { %409 = vmatpush3.msra.mxu0 %v234_v14  ;;  %378 = vmatpush3.msra.mxu1 %v137_v15  ;;  %v330_v52 = vld [vmem:[#allocation2] ss:$0 sm:$0xff] }
  0x10   :  { %410 = vmatprep.subr.mxu0 %v442_v1  ;;  %379 = vmatprep.subr.mxu1 %v442_v1 }
  0x11   :  { %411 = vmatpush3.msra.mxu0 %v233_v16  ;;  %380 = vmatpush3.msra.mxu1 %v136_v17 }
  0x12   :  { %412 = vmatprep.subr.mxu0 %v442_v1  ;;  %381 = vmatprep.subr.mxu1 %v442_v1 }
  0x13   :  { %413 = vmatpush3.msra.mxu0 %v232_v18  ;;  %382 = vmatpush3.msra.mxu1 %v135_v19 }
  0x14   :  { %414 = vmatprep.subr.mxu0 %v442_v1  ;;  %383 = vmatprep.subr.mxu1 %v442_v1 }
  0x15   :  { %415 = vmatpush3.msra.mxu0 %v231_v20  ;;  %384 = vmatpush3.msra.mxu1 %v134_v21 }
  0x16   :  { %416 = vmatprep.subr.mxu0 %v442_v1  ;;  %385 = vmatprep.subr.mxu1 %v442_v1 }
  0x17   :  { %417 = vmatpush3.msra.mxu0 %v230_v22  ;;  %386 = vmatpush3.msra.mxu1 %v133_v23 }
  0x18   :  { %418 = vmatprep.subr.mxu0 %v442_v1  ;;  %387 = vmatprep.subr.mxu1 %v442_v1 }
  0x19   :  { %419 = vmatpush3.msra.mxu0 %v229_v24  ;;  %388 = vmatpush3.msra.mxu1 %v132_v25 }
  0x1a   :  { %420 = vmatprep.subr.mxu0 %v442_v1  ;;  %389 = vmatprep.subr.mxu1 %v442_v1 }
  0x1b   :  { %421 = vmatpush3.msra.mxu0 %v228_v26  ;;  %390 = vmatpush3.msra.mxu1 %v131_v27 }
  0x1c   :  { %422 = vmatprep.subr.mxu0 %v442_v1  ;;  %391 = vmatprep.subr.mxu1 %v442_v1 }
  0x1d   :  { %423 = vmatpush3.msra.mxu0 %v227_v28  ;;  %392 = vmatpush3.msra.mxu1 %v130_v29 }
  0x1e   :  { %424 = vmatprep.subr.mxu0 %v442_v1  ;;  %393 = vmatprep.subr.mxu1 %v442_v1 }
  0x1f   :  { %425 = vmatpush3.msra.mxu0 %v226_v30  ;;  %394 = vmatpush3.msra.mxu1 %v129_v31 }
  0x20   :  { %426 = vmatprep.subr.mxu0 %v442_v1  ;;  %395 = vmatprep.subr.mxu1 %v442_v1 }
  0x21   :  { %427 = vmatpush3.msra.mxu0 %v225_v32  ;;  %396 = vmatpush3.msra.mxu1 %v128_v33 }
  0x22   :  { %428 = vmatprep.subr.mxu0 %v442_v1  ;;  %432 = vmatprep.mubr.msk.f32.mxu0 %vm443_vm2, %v442_v1 }
  0x23   :  { %429 = vmatpush3.msra.mxu0 %v224_v34 }
  0x24   :  { %430 = vmatprep.subr.mxu0 %v442_v1 }
  0x25   :  { %431 = vmatpush3.msra.mxu0 %v223_v35 }
  0xc6   :  { %v121_v43 = vpop.f32.mrf.mxu0 }
  0xc7   :  { %v122_v44 = vadd.f32 %v121_v43, %v37_v41 }
  0xc8   :  { %v123_v45 = vpop.f32.mrf.mxu0 }
  0xc9   :  { %438 = vtanh.f32 %v122_v44  ;;  %v124_v46 = vadd.f32 %v123_v45, %v41_v42 }
  0xcb   :  { %440 = vtanh.f32 %v124_v46 }
  0xd6   :  { %v439_v47 = vpop.eup %438 }
  0xd7   :  { %398 = vmatmul.mubr.f32.vlgmr.msra.gmra.mxu1 %v439_v47 }
  0xd8   :  { %v441_v48 = vpop.eup %440 }
  0xd9   :  { %433 = vmatmul.mubr.f32.vlgmr.msra.gmra.mxu0 %v441_v48 }
 0x197   :  { %v217_v51 = vpop.f32.mrf.mxu1 }
 0x198   :  { %v218_v53 = vadd.f32 %v329_v50, %v217_v51 }
 0x199   :  { %v399_v54 = vpop.f32.mrf.mxu1  ;;  %v312_v55 = vpop.f32.mrf.mxu0 }
 0x19a   :  { %222 = vst.msk [vmem:[%s650_s7] sm:$0xff] %vm221_vm3, %v218_v53  ;;  %v313_v56 = vadd.f32 %v330_v52, %v312_v55 }
 0x19b   :  { %v434_v57 = vpop.f32.mrf.mxu0 }
 0x19c   :  { %317 = vst.msk [vmem:[%s651_s8] sm:$0xff] %vm316_vm4, %v313_v56 }

</bundles_post_ra>
